<compile_context>
chip_gen: v7x
topology: tpu7x:2x2x1
jax: 0.10.0
libtpu: 0.0.40
codegen_flags: <defaults>
</compile_context>

<pallas_src>
import functools

import jax
import jax.numpy as jnp
from jax import lax
from jax.experimental import pallas as pl
from jax.experimental.pallas import tpu as pltpu

LN_EPS = 1e-5
NEG_INF = -1e30  # large finite negative: avoids inf-inf -> NaN on masked rows


def _layer_norm(x, gamma, beta):
    mu = jnp.mean(x, axis=-1, keepdims=True)
    var = jnp.mean((x - mu) ** 2, axis=-1, keepdims=True)
    return (x - mu) * lax.rsqrt(var + LN_EPS) * gamma + beta


def _block_noskip_kernel(
    x_ref,                      # (Bb, T, C)   f32
    wqkv_ref,                   # (C, 3C)      bf16  (Wq | Wk | Wv fused)
    wproj_ref, bproj_ref,       # (C, C) bf16, (1, C) f32
    g1_ref, beta1_ref,          # (1, C) f32   LayerNorm1
    g2_ref, beta2_ref,          # (1, C) f32   LayerNorm2
    w1_ref, b1_ref,             # (C, 4C) bf16, (1, 4C) f32
    w2_ref, b2_ref,             # (4C, C) bf16, (1, C)  f32
    o_ref,                      # (Bb, T, C)
    *, n_head: int, head_size: int,
):
    Bb, T, C = x_ref.shape
    H, hs = n_head, head_size

    x = x_ref[...].astype(jnp.float32).reshape(Bb * T, C)

    # ---- LayerNorm 1 (f32) ----
    h = _layer_norm(x, g1_ref[...], beta1_ref[...])                 # (Bb*T, C)

    # ---- fused QKV projection: one MXU matmul, bf16 operands, f32 accum ----
    qkv = jnp.dot(h.astype(jnp.bfloat16), wqkv_ref[...],
                  preferred_element_type=jnp.float32)               # (Bb*T, 3C)
    q = qkv[:, 0 * C:1 * C]
    k = qkv[:, 1 * C:2 * C]
    v = qkv[:, 2 * C:3 * C]

    # Gather heads into one batch dim (head-major, batch-minor): (H*Bb, T, hs).
    # Slices / leading-dim reshapes done in f32 so splits land on clean
    # (8, 128) tile boundaries (T is a multiple of 8).
    def to_heads(z):
        return jnp.concatenate(
            [z[:, i * hs:(i + 1) * hs].reshape(Bb, T, hs) for i in range(H)],
            axis=0)

    qh = to_heads(q).astype(jnp.bfloat16)
    kh = to_heads(k).astype(jnp.bfloat16)
    vh = to_heads(v).astype(jnp.bfloat16)

    # ---- batched causal self-attention over all (head, batch-row) pairs ----
    scale = head_size ** (-0.5)
    row = lax.broadcasted_iota(jnp.int32, (T, T), 0)
    col = lax.broadcasted_iota(jnp.int32, (T, T), 1)
    causal = (col <= row)[None, :, :]                               # (1, T, T)

    scores = jnp.einsum("bqd,bkd->bqk", qh, kh,
                        preferred_element_type=jnp.float32) * scale
    scores = jnp.where(causal, scores, NEG_INF)
    scores = scores - jnp.max(scores, axis=-1, keepdims=True)
    probs = jnp.exp(scores)
    probs = probs * pl.reciprocal(
        jnp.sum(probs, axis=-1, keepdims=True), approx=True)
    # (attention dropout = identity, eval mode)
    att = jnp.einsum("bqk,bkd->bqd", probs.astype(jnp.bfloat16), vh,
                     preferred_element_type=jnp.float32)            # (H*Bb, T, hs)

    # back to (Bb*T, C): lane-concatenate per-head outputs
    att = jnp.concatenate(
        [att[i * Bb:(i + 1) * Bb].reshape(Bb * T, hs) for i in range(H)],
        axis=-1)

    # ---- output projection (dropout = identity) ----
    sa = jnp.dot(att.astype(jnp.bfloat16), wproj_ref[...],
                 preferred_element_type=jnp.float32) + bproj_ref[...]

    # ---- LayerNorm 2 on attention output (NO residual/skip) ----
    h2 = _layer_norm(sa, g2_ref[...], beta2_ref[...])

    # ---- FeedForward: Linear -> ReLU -> Linear (dropout = identity) ----
    ff = jnp.dot(h2.astype(jnp.bfloat16), w1_ref[...],
                 preferred_element_type=jnp.float32) + b1_ref[...]
    ff = jnp.maximum(ff, 0.0)
    out = jnp.dot(ff.astype(jnp.bfloat16), w2_ref[...],
                  preferred_element_type=jnp.float32) + b2_ref[...]

    o_ref[...] = out.reshape(Bb, T, C).astype(o_ref.dtype)


def _pick_block_b(B, max_block=4):
    bb = min(B, max_block)
    while B % bb:
        bb -= 1
    return bb


def block_noskip(x, params, *, n_head, block_b=None):
    """x: (B, T, C) float32. params: dict of f32 weights (wq/wk/wv/wproj/w1/w2
    stored as (in, out), i.e. y = x @ W + b). Returns (B, T, C)."""
    B, T, C = x.shape
    assert C % n_head == 0
    head_size = C // n_head
    if block_b is None:
        block_b = _pick_block_b(B)
    assert B % block_b == 0

    bf16 = jnp.bfloat16
    f32 = jnp.float32
    # fuse QKV weights and cast matmul weights to bf16 (f32 accumulation in-kernel)
    wqkv = jnp.concatenate(
        [params["wq"], params["wk"], params["wv"]], axis=1).astype(bf16)
    wproj = params["wproj"].astype(bf16)
    w1 = params["w1"].astype(bf16)
    w2 = params["w2"].astype(bf16)

    def const_spec(shape):
        return pl.BlockSpec(shape, lambda b, _s=len(shape): (0,) * _s)

    kernel = functools.partial(
        _block_noskip_kernel, n_head=n_head, head_size=head_size)

    return pl.pallas_call(
        kernel,
        out_shape=jax.ShapeDtypeStruct((B, T, C), x.dtype),
        grid_spec=pltpu.PrefetchScalarGridSpec(
            num_scalar_prefetch=0,
            grid=(B // block_b,),
            in_specs=[
                pl.BlockSpec((block_b, T, C), lambda b: (b, 0, 0)),  # x
                const_spec((C, 3 * C)),                              # Wqkv (bf16)
                const_spec((C, C)),                                  # Wproj (bf16)
                const_spec((1, C)),                                  # bproj
                const_spec((1, C)),                                  # ln1 gamma
                const_spec((1, C)),                                  # ln1 beta
                const_spec((1, C)),                                  # ln2 gamma
                const_spec((1, C)),                                  # ln2 beta
                const_spec((C, 4 * C)),                              # W1 (bf16)
                const_spec((1, 4 * C)),                              # b1
                const_spec((4 * C, C)),                              # W2 (bf16)
                const_spec((1, C)),                                  # b2
            ],
            out_specs=pl.BlockSpec((block_b, T, C), lambda b: (b, 0, 0)),
        ),
        compiler_params=pltpu.CompilerParams(
            dimension_semantics=("parallel",),
            vmem_limit_bytes=32 * 1024 * 1024,
        ),
    )(
        x,
        wqkv,
        wproj, params["bproj"].astype(f32),
        params["g1"].astype(f32), params["beta1"].astype(f32),
        params["g2"].astype(f32), params["beta2"].astype(f32),
        w1, params["b1"].astype(f32),
        w2, params["b2"].astype(f32),
    )


def _reference(x, params, n_head):
    """Pure-JAX reference of BlockNoSkip (eval mode), mirroring the kernel's
    bf16-operand / f32-accumulation matmul precision."""
    B, T, C = x.shape
    hs = C // n_head
    bf16 = jnp.bfloat16
    f32 = jnp.float32

    wq = params["wq"].astype(bf16)
    wk = params["wk"].astype(bf16)
    wv = params["wv"].astype(bf16)
    wp = params["wproj"].astype(bf16)
    w1 = params["w1"].astype(bf16)
    w2 = params["w2"].astype(bf16)

    def ln(v, g, b):
        mu = jnp.mean(v, axis=-1, keepdims=True)
        var = jnp.mean((v - mu) ** 2, axis=-1, keepdims=True)
        return (v - mu) * lax.rsqrt(var + LN_EPS) * g + b

    def mm(a, w):
        return jnp.einsum("btc,cd->btd", a.astype(bf16), w,
                          preferred_element_type=f32)

    h = ln(x, params["g1"][0], params["beta1"][0])
    q = mm(h, wq).reshape(B, T, n_head, hs).transpose(0, 2, 1, 3).astype(bf16)
    k = mm(h, wk).reshape(B, T, n_head, hs).transpose(0, 2, 1, 3).astype(bf16)
    v = mm(h, wv).reshape(B, T, n_head, hs).transpose(0, 2, 1, 3).astype(bf16)

    wei = jnp.einsum("bhqd,bhkd->bhqk", q, k,
                     preferred_element_type=f32) * (hs ** -0.5)
    mask = jnp.tril(jnp.ones((T, T), bool))
    wei = jnp.where(mask, wei, NEG_INF)
    wei = jax.nn.softmax(wei, axis=-1)
    att = jnp.einsum("bhqk,bhkd->bhqd", wei.astype(bf16), v,
                     preferred_element_type=f32)
    att = att.transpose(0, 2, 1, 3).reshape(B, T, C)

    sa = mm(att, wp) + params["bproj"][0]
    h2 = ln(sa, params["g2"][0], params["beta2"][0])
    ff = jnp.maximum(mm(h2, w1) + params["b1"][0], 0.0)
    return mm(ff, w2) + params["b2"][0]


if __name__ == "__main__":
    # Small shapes consistent with the module: n_embd=32, n_head=4, T=8, B=2.
    B, T, C, H = 2, 8, 32, 4
    key = jax.random.PRNGKey(0)
    ks = jax.random.split(key, 12)
    s = 0.05
    params = {
        "wq": jax.random.normal(ks[0], (C, C), jnp.float32) * s,
        "wk": jax.random.normal(ks[1], (C, C), jnp.float32) * s,
        "wv": jax.random.normal(ks[2], (C, C), jnp.float32) * s,
        "wproj": jax.random.normal(ks[3], (C, C), jnp.float32) * s,
        "bproj": jax.random.normal(ks[4], (1, C), jnp.float32) * s,
        "g1": jnp.ones((1, C), jnp.float32),
        "beta1": jnp.zeros((1, C), jnp.float32),
        "g2": jnp.ones((1, C), jnp.float32),
        "beta2": jnp.zeros((1, C), jnp.float32),
        "w1": jax.random.normal(ks[5], (C, 4 * C), jnp.float32) * s,
        "b1": jax.random.normal(ks[6], (1, 4 * C), jnp.float32) * s,
        "w2": jax.random.normal(ks[7], (4 * C, C), jnp.float32) * s,
        "b2": jax.random.normal(ks[8], (1, C), jnp.float32) * s,
    }
    x = jax.random.normal(ks[9], (B, T, C), jnp.float32)

    out = jax.block_until_ready(block_noskip(x, params, n_head=H))
    ref = _reference(x, params, H)
    assert out.shape == (B, T, C)
    max_err = float(jnp.max(jnp.abs(out - ref)))
    assert jnp.allclose(out, ref, atol=2e-2, rtol=2e-2), (
        f"mismatch vs JAX reference, max abs err = {max_err}")
    print("KERNEL_OK")
</pallas_src>

<mosaic_0001>
module attributes {stable_mosaic.version = 11 : i64} {
  func.func @_block_noskip_kernel(%arg0: i32, %arg1: memref<2x8x32xf32, #tpu.memory_space<vmem>>, %arg2: memref<32x96xbf16, #tpu.memory_space<vmem>>, %arg3: memref<32x32xbf16, #tpu.memory_space<vmem>>, %arg4: memref<1x32xf32, #tpu.memory_space<vmem>>, %arg5: memref<1x32xf32, #tpu.memory_space<vmem>>, %arg6: memref<1x32xf32, #tpu.memory_space<vmem>>, %arg7: memref<1x32xf32, #tpu.memory_space<vmem>>, %arg8: memref<1x32xf32, #tpu.memory_space<vmem>>, %arg9: memref<32x128xbf16, #tpu.memory_space<vmem>>, %arg10: memref<1x128xf32, #tpu.memory_space<vmem>>, %arg11: memref<128x32xbf16, #tpu.memory_space<vmem>>, %arg12: memref<1x32xf32, #tpu.memory_space<vmem>>, %arg13: memref<2x8x32xf32, #tpu.memory_space<vmem>>) attributes {dimension_semantics = [#tpu.dimension_semantics<parallel>], iteration_bounds = array<i64: 1>, scalar_prefetch = 0 : i64, scratch_operands = 0 : i64, tpu.core_type = #tpu.core_type<tc>, window_params = [{transform_indices = @transform_0, window_bounds = array<i64: 2, 8, 32>}, {pipeline_mode = #tpu.pipeline_mode<synchronous>, transform_indices = @transform_1, window_bounds = array<i64: 32, 96>}, {pipeline_mode = #tpu.pipeline_mode<synchronous>, transform_indices = @transform_2, window_bounds = array<i64: 32, 32>}, {pipeline_mode = #tpu.pipeline_mode<synchronous>, transform_indices = @transform_3, window_bounds = array<i64: 1, 32>}, {pipeline_mode = #tpu.pipeline_mode<synchronous>, transform_indices = @transform_4, window_bounds = array<i64: 1, 32>}, {pipeline_mode = #tpu.pipeline_mode<synchronous>, transform_indices = @transform_5, window_bounds = array<i64: 1, 32>}, {pipeline_mode = #tpu.pipeline_mode<synchronous>, transform_indices = @transform_6, window_bounds = array<i64: 1, 32>}, {pipeline_mode = #tpu.pipeline_mode<synchronous>, transform_indices = @transform_7, window_bounds = array<i64: 1, 32>}, {pipeline_mode = #tpu.pipeline_mode<synchronous>, transform_indices = @transform_8, window_bounds = array<i64: 32, 128>}, {pipeline_mode = #tpu.pipeline_mode<synchronous>, transform_indices = @transform_9, window_bounds = array<i64: 1, 128>}, {pipeline_mode = #tpu.pipeline_mode<synchronous>, transform_indices = @transform_10, window_bounds = array<i64: 128, 32>}, {pipeline_mode = #tpu.pipeline_mode<synchronous>, transform_indices = @transform_11, window_bounds = array<i64: 1, 32>}, {transform_indices = @transform_12, window_bounds = array<i64: 2, 8, 32>}]} {
    %c0 = arith.constant 0 : index
    %c0_0 = arith.constant 0 : index
    %c0_1 = arith.constant 0 : index
    %0 = vector.load %arg1[%c0, %c0_0, %c0_1] : memref<2x8x32xf32, #tpu.memory_space<vmem>>, vector<2x8x32xf32>
    %1 = vector.shape_cast %0 : vector<2x8x32xf32> to vector<16x32xf32>
    %c0_2 = arith.constant 0 : index
    %c0_3 = arith.constant 0 : index
    %2 = vector.load %arg5[%c0_2, %c0_3] : memref<1x32xf32, #tpu.memory_space<vmem>>, vector<1x32xf32>
    %c0_4 = arith.constant 0 : index
    %c0_5 = arith.constant 0 : index
    %3 = vector.load %arg6[%c0_4, %c0_5] : memref<1x32xf32, #tpu.memory_space<vmem>>, vector<1x32xf32>
    %cst = arith.constant dense<0.000000e+00> : vector<16xf32>
    %4 = vector.multi_reduction <add>, %1, %cst [1] : vector<16x32xf32> to vector<16xf32>
    %5 = vector.shape_cast %4 : vector<16xf32> to vector<16x1xf32>
    %cst_6 = arith.constant 3.200000e+01 : f32
    %6 = vector.broadcast %cst_6 : f32 to vector<16x1xf32>
    %7 = arith.divf %5, %6 : vector<16x1xf32>
    %8 = vector.broadcast %7 : vector<16x1xf32> to vector<16x32xf32>
    %9 = arith.subf %1, %8 : vector<16x32xf32>
    %10 = arith.mulf %9, %9 : vector<16x32xf32>
    %cst_7 = arith.constant dense<0.000000e+00> : vector<16xf32>
    %11 = vector.multi_reduction <add>, %10, %cst_7 [1] : vector<16x32xf32> to vector<16xf32>
    %12 = vector.shape_cast %11 : vector<16xf32> to vector<16x1xf32>
    %cst_8 = arith.constant 3.200000e+01 : f32
    %13 = vector.broadcast %cst_8 : f32 to vector<16x1xf32>
    %14 = arith.divf %12, %13 : vector<16x1xf32>
    %15 = vector.broadcast %7 : vector<16x1xf32> to vector<16x32xf32>
    %16 = arith.subf %1, %15 : vector<16x32xf32>
    %cst_9 = arith.constant 9.99999974E-6 : f32
    %17 = vector.broadcast %cst_9 : f32 to vector<16x1xf32>
    %18 = arith.addf %14, %17 : vector<16x1xf32>
    %19 = math.rsqrt %18 : vector<16x1xf32>
    %20 = vector.broadcast %19 : vector<16x1xf32> to vector<16x32xf32>
    %21 = arith.mulf %16, %20 : vector<16x32xf32>
    %22 = vector.broadcast %2 : vector<1x32xf32> to vector<16x32xf32>
    %23 = arith.mulf %21, %22 : vector<16x32xf32>
    %24 = vector.broadcast %3 : vector<1x32xf32> to vector<16x32xf32>
    %25 = arith.addf %23, %24 : vector<16x32xf32>
    %26 = arith.truncf %25 : vector<16x32xf32> to vector<16x32xbf16>
    %c0_10 = arith.constant 0 : index
    %c0_11 = arith.constant 0 : index
    %27 = vector.load %arg2[%c0_10, %c0_11] : memref<32x96xbf16, #tpu.memory_space<vmem>>, vector<32x96xbf16>
    %cst_12 = arith.constant dense<0.000000e+00> : vector<16x96xf32>
    %28 = tpu.matmul %26, %27, %cst_12 {dimension_numbers = #tpu.dot_dimension_numbers<[1], [0], [0], [1], [0, 0, 1, 1], [], []>} : vector<16x32xbf16>, vector<32x96xbf16>, vector<16x96xf32> -> vector<16x96xf32>
    %29 = vector.extract_strided_slice %28 {offsets = [0, 0], sizes = [16, 32], strides = [1, 1]} : vector<16x96xf32> to vector<16x32xf32>
    %30 = vector.extract_strided_slice %28 {offsets = [0, 32], sizes = [16, 32], strides = [1, 1]} : vector<16x96xf32> to vector<16x32xf32>
    %31 = vector.extract_strided_slice %28 {offsets = [0, 64], sizes = [16, 32], strides = [1, 1]} : vector<16x96xf32> to vector<16x32xf32>
    %32 = vector.extract_strided_slice %29 {offsets = [0, 0], sizes = [16, 8], strides = [1, 1]} : vector<16x32xf32> to vector<16x8xf32>
    %33 = vector.shape_cast %32 : vector<16x8xf32> to vector<2x8x8xf32>
    %34 = vector.extract_strided_slice %29 {offsets = [0, 8], sizes = [16, 8], strides = [1, 1]} : vector<16x32xf32> to vector<16x8xf32>
    %35 = vector.shape_cast %34 : vector<16x8xf32> to vector<2x8x8xf32>
    %36 = vector.extract_strided_slice %29 {offsets = [0, 16], sizes = [16, 8], strides = [1, 1]} : vector<16x32xf32> to vector<16x8xf32>
    %37 = vector.shape_cast %36 : vector<16x8xf32> to vector<2x8x8xf32>
    %38 = vector.extract_strided_slice %29 {offsets = [0, 24], sizes = [16, 8], strides = [1, 1]} : vector<16x32xf32> to vector<16x8xf32>
    %39 = vector.shape_cast %38 : vector<16x8xf32> to vector<2x8x8xf32>
    %40 = tpu.concatenate %33, %35, %37, %39 in 0 : vector<2x8x8xf32>, vector<2x8x8xf32>, vector<2x8x8xf32>, vector<2x8x8xf32> -> vector<8x8x8xf32>
    %41 = arith.truncf %40 : vector<8x8x8xf32> to vector<8x8x8xbf16>
    %42 = vector.extract_strided_slice %30 {offsets = [0, 0], sizes = [16, 8], strides = [1, 1]} : vector<16x32xf32> to vector<16x8xf32>
    %43 = vector.shape_cast %42 : vector<16x8xf32> to vector<2x8x8xf32>
    %44 = vector.extract_strided_slice %30 {offsets = [0, 8], sizes = [16, 8], strides = [1, 1]} : vector<16x32xf32> to vector<16x8xf32>
    %45 = vector.shape_cast %44 : vector<16x8xf32> to vector<2x8x8xf32>
    %46 = vector.extract_strided_slice %30 {offsets = [0, 16], sizes = [16, 8], strides = [1, 1]} : vector<16x32xf32> to vector<16x8xf32>
    %47 = vector.shape_cast %46 : vector<16x8xf32> to vector<2x8x8xf32>
    %48 = vector.extract_strided_slice %30 {offsets = [0, 24], sizes = [16, 8], strides = [1, 1]} : vector<16x32xf32> to vector<16x8xf32>
    %49 = vector.shape_cast %48 : vector<16x8xf32> to vector<2x8x8xf32>
    %50 = tpu.concatenate %43, %45, %47, %49 in 0 : vector<2x8x8xf32>, vector<2x8x8xf32>, vector<2x8x8xf32>, vector<2x8x8xf32> -> vector<8x8x8xf32>
    %51 = arith.truncf %50 : vector<8x8x8xf32> to vector<8x8x8xbf16>
    %52 = vector.extract_strided_slice %31 {offsets = [0, 0], sizes = [16, 8], strides = [1, 1]} : vector<16x32xf32> to vector<16x8xf32>
    %53 = vector.shape_cast %52 : vector<16x8xf32> to vector<2x8x8xf32>
    %54 = vector.extract_strided_slice %31 {offsets = [0, 8], sizes = [16, 8], strides = [1, 1]} : vector<16x32xf32> to vector<16x8xf32>
    %55 = vector.shape_cast %54 : vector<16x8xf32> to vector<2x8x8xf32>
    %56 = vector.extract_strided_slice %31 {offsets = [0, 16], sizes = [16, 8], strides = [1, 1]} : vector<16x32xf32> to vector<16x8xf32>
    %57 = vector.shape_cast %56 : vector<16x8xf32> to vector<2x8x8xf32>
    %58 = vector.extract_strided_slice %31 {offsets = [0, 24], sizes = [16, 8], strides = [1, 1]} : vector<16x32xf32> to vector<16x8xf32>
    %59 = vector.shape_cast %58 : vector<16x8xf32> to vector<2x8x8xf32>
    %60 = tpu.concatenate %53, %55, %57, %59 in 0 : vector<2x8x8xf32>, vector<2x8x8xf32>, vector<2x8x8xf32>, vector<2x8x8xf32> -> vector<8x8x8xf32>
    %61 = arith.truncf %60 : vector<8x8x8xf32> to vector<8x8x8xbf16>
    %62 = tpu.iota {dimensions = array<i32: 0>} : vector<8x8xi32>
    %63 = tpu.iota {dimensions = array<i32: 1>} : vector<8x8xi32>
    %64 = arith.cmpi sle, %63, %62 : vector<8x8xi32>
    %65 = vector.shape_cast %64 : vector<8x8xi1> to vector<1x8x8xi1>
    "tpu.trace_start"() <{level = 10 : i32, message = "bqd,bkd->bqk"}> : () -> ()
    %cst_13 = arith.constant dense<0.000000e+00> : vector<8x8x8xf32>
    %66 = tpu.matmul %41, %51, %cst_13 {dimension_numbers = #tpu.dot_dimension_numbers<[2], [2], [1], [1], [0, 0, 0, 1, 1, 1], [0], [0]>} : vector<8x8x8xbf16>, vector<8x8x8xbf16>, vector<8x8x8xf32> -> vector<8x8x8xf32>
    "tpu.trace_stop"() : () -> ()
    %cst_14 = arith.constant 0.353553385 : f32
    %67 = vector.broadcast %cst_14 : f32 to vector<8x8x8xf32>
    %68 = arith.mulf %66, %67 : vector<8x8x8xf32>
    %cst_15 = arith.constant -1.000000e+30 : f32
    %69 = vector.shape_cast %65 : vector<1x8x8xi1> to vector<1x8x8xi1>
    %70 = vector.broadcast %69 : vector<1x8x8xi1> to vector<8x8x8xi1>
    %71 = vector.broadcast %cst_15 : f32 to vector<8x8x8xf32>
    %72 = arith.select %70, %68, %71 : vector<8x8x8xi1>, vector<8x8x8xf32>
    %cst_16 = arith.constant dense<0xFF800000> : vector<8x8xf32>
    %73 = vector.multi_reduction <maximumf>, %72, %cst_16 [2] : vector<8x8x8xf32> to vector<8x8xf32>
    %74 = vector.shape_cast %73 : vector<8x8xf32> to vector<8x8x1xf32>
    %75 = vector.broadcast %74 : vector<8x8x1xf32> to vector<8x8x8xf32>
    %76 = arith.subf %72, %75 : vector<8x8x8xf32>
    %77 = math.exp %76 : vector<8x8x8xf32>
    %cst_17 = arith.constant dense<0.000000e+00> : vector<8x8xf32>
    %78 = vector.multi_reduction <add>, %77, %cst_17 [2] : vector<8x8x8xf32> to vector<8x8xf32>
    %79 = vector.shape_cast %78 : vector<8x8xf32> to vector<8x8x1xf32>
    %80 = tpu.reciprocal %79 {approx = true} : vector<8x8x1xf32> -> vector<8x8x1xf32>
    %81 = vector.broadcast %80 : vector<8x8x1xf32> to vector<8x8x8xf32>
    %82 = arith.mulf %77, %81 : vector<8x8x8xf32>
    %83 = arith.truncf %82 : vector<8x8x8xf32> to vector<8x8x8xbf16>
    "tpu.trace_start"() <{level = 10 : i32, message = "bqk,bkd->bqd"}> : () -> ()
    %cst_18 = arith.constant dense<0.000000e+00> : vector<8x8x8xf32>
    %84 = tpu.matmul %83, %61, %cst_18 {dimension_numbers = #tpu.dot_dimension_numbers<[2], [1], [1], [2], [0, 0, 0, 1, 1, 2], [0], [0]>} : vector<8x8x8xbf16>, vector<8x8x8xbf16>, vector<8x8x8xf32> -> vector<8x8x8xf32>
    "tpu.trace_stop"() : () -> ()
    %85 = vector.extract_strided_slice %84 {offsets = [0, 0, 0], sizes = [2, 8, 8], strides = [1, 1, 1]} : vector<8x8x8xf32> to vector<2x8x8xf32>
    %86 = vector.shape_cast %85 : vector<2x8x8xf32> to vector<16x8xf32>
    %87 = vector.extract_strided_slice %84 {offsets = [2, 0, 0], sizes = [2, 8, 8], strides = [1, 1, 1]} : vector<8x8x8xf32> to vector<2x8x8xf32>
    %88 = vector.shape_cast %87 : vector<2x8x8xf32> to vector<16x8xf32>
    %89 = vector.extract_strided_slice %84 {offsets = [4, 0, 0], sizes = [2, 8, 8], strides = [1, 1, 1]} : vector<8x8x8xf32> to vector<2x8x8xf32>
    %90 = vector.shape_cast %89 : vector<2x8x8xf32> to vector<16x8xf32>
    %91 = vector.extract_strided_slice %84 {offsets = [6, 0, 0], sizes = [2, 8, 8], strides = [1, 1, 1]} : vector<8x8x8xf32> to vector<2x8x8xf32>
    %92 = vector.shape_cast %91 : vector<2x8x8xf32> to vector<16x8xf32>
    %93 = tpu.concatenate %86, %88, %90, %92 in 1 : vector<16x8xf32>, vector<16x8xf32>, vector<16x8xf32>, vector<16x8xf32> -> vector<16x32xf32>
    %94 = arith.truncf %93 : vector<16x32xf32> to vector<16x32xbf16>
    %c0_19 = arith.constant 0 : index
    %c0_20 = arith.constant 0 : index
    %95 = vector.load %arg3[%c0_19, %c0_20] : memref<32x32xbf16, #tpu.memory_space<vmem>>, vector<32x32xbf16>
    %cst_21 = arith.constant dense<0.000000e+00> : vector<16x32xf32>
    %96 = tpu.matmul %94, %95, %cst_21 {dimension_numbers = #tpu.dot_dimension_numbers<[1], [0], [0], [1], [0, 0, 1, 1], [], []>} : vector<16x32xbf16>, vector<32x32xbf16>, vector<16x32xf32> -> vector<16x32xf32>
    %c0_22 = arith.constant 0 : index
    %c0_23 = arith.constant 0 : index
    %97 = vector.load %arg4[%c0_22, %c0_23] : memref<1x32xf32, #tpu.memory_space<vmem>>, vector<1x32xf32>
    %98 = vector.broadcast %97 : vector<1x32xf32> to vector<16x32xf32>
    %99 = arith.addf %96, %98 : vector<16x32xf32>
    %c0_24 = arith.constant 0 : index
    %c0_25 = arith.constant 0 : index
    %100 = vector.load %arg7[%c0_24, %c0_25] : memref<1x32xf32, #tpu.memory_space<vmem>>, vector<1x32xf32>
    %c0_26 = arith.constant 0 : index
    %c0_27 = arith.constant 0 : index
    %101 = vector.load %arg8[%c0_26, %c0_27] : memref<1x32xf32, #tpu.memory_space<vmem>>, vector<1x32xf32>
    %cst_28 = arith.constant dense<0.000000e+00> : vector<16xf32>
    %102 = vector.multi_reduction <add>, %99, %cst_28 [1] : vector<16x32xf32> to vector<16xf32>
    %103 = vector.shape_cast %102 : vector<16xf32> to vector<16x1xf32>
    %cst_29 = arith.constant 3.200000e+01 : f32
    %104 = vector.broadcast %cst_29 : f32 to vector<16x1xf32>
    %105 = arith.divf %103, %104 : vector<16x1xf32>
    %106 = vector.broadcast %105 : vector<16x1xf32> to vector<16x32xf32>
    %107 = arith.subf %99, %106 : vector<16x32xf32>
    %108 = arith.mulf %107, %107 : vector<16x32xf32>
    %cst_30 = arith.constant dense<0.000000e+00> : vector<16xf32>
    %109 = vector.multi_reduction <add>, %108, %cst_30 [1] : vector<16x32xf32> to vector<16xf32>
    %110 = vector.shape_cast %109 : vector<16xf32> to vector<16x1xf32>
    %cst_31 = arith.constant 3.200000e+01 : f32
    %111 = vector.broadcast %cst_31 : f32 to vector<16x1xf32>
    %112 = arith.divf %110, %111 : vector<16x1xf32>
    %113 = vector.broadcast %105 : vector<16x1xf32> to vector<16x32xf32>
    %114 = arith.subf %99, %113 : vector<16x32xf32>
    %cst_32 = arith.constant 9.99999974E-6 : f32
    %115 = vector.broadcast %cst_32 : f32 to vector<16x1xf32>
    %116 = arith.addf %112, %115 : vector<16x1xf32>
    %117 = math.rsqrt %116 : vector<16x1xf32>
    %118 = vector.broadcast %117 : vector<16x1xf32> to vector<16x32xf32>
    %119 = arith.mulf %114, %118 : vector<16x32xf32>
    %120 = vector.broadcast %100 : vector<1x32xf32> to vector<16x32xf32>
    %121 = arith.mulf %119, %120 : vector<16x32xf32>
    %122 = vector.broadcast %101 : vector<1x32xf32> to vector<16x32xf32>
    %123 = arith.addf %121, %122 : vector<16x32xf32>
    %124 = arith.truncf %123 : vector<16x32xf32> to vector<16x32xbf16>
    %c0_33 = arith.constant 0 : index
    %c0_34 = arith.constant 0 : index
    %125 = vector.load %arg9[%c0_33, %c0_34] : memref<32x128xbf16, #tpu.memory_space<vmem>>, vector<32x128xbf16>
    %cst_35 = arith.constant dense<0.000000e+00> : vector<16x128xf32>
    %126 = tpu.matmul %124, %125, %cst_35 {dimension_numbers = #tpu.dot_dimension_numbers<[1], [0], [0], [1], [0, 0, 1, 1], [], []>} : vector<16x32xbf16>, vector<32x128xbf16>, vector<16x128xf32> -> vector<16x128xf32>
    %c0_36 = arith.constant 0 : index
    %c0_37 = arith.constant 0 : index
    %127 = vector.load %arg10[%c0_36, %c0_37] : memref<1x128xf32, #tpu.memory_space<vmem>>, vector<1x128xf32>
    %128 = vector.broadcast %127 : vector<1x128xf32> to vector<16x128xf32>
    %129 = arith.addf %126, %128 : vector<16x128xf32>
    %cst_38 = arith.constant 0.000000e+00 : f32
    %130 = vector.broadcast %cst_38 : f32 to vector<16x128xf32>
    %131 = arith.maximumf %129, %130 : vector<16x128xf32>
    %132 = arith.truncf %131 : vector<16x128xf32> to vector<16x128xbf16>
    %c0_39 = arith.constant 0 : index
    %c0_40 = arith.constant 0 : index
    %133 = vector.load %arg11[%c0_39, %c0_40] : memref<128x32xbf16, #tpu.memory_space<vmem>>, vector<128x32xbf16>
    %cst_41 = arith.constant dense<0.000000e+00> : vector<16x32xf32>
    %134 = tpu.matmul %132, %133, %cst_41 {dimension_numbers = #tpu.dot_dimension_numbers<[1], [0], [0], [1], [0, 0, 1, 1], [], []>} : vector<16x128xbf16>, vector<128x32xbf16>, vector<16x32xf32> -> vector<16x32xf32>
    %c0_42 = arith.constant 0 : index
    %c0_43 = arith.constant 0 : index
    %135 = vector.load %arg12[%c0_42, %c0_43] : memref<1x32xf32, #tpu.memory_space<vmem>>, vector<1x32xf32>
    %136 = vector.broadcast %135 : vector<1x32xf32> to vector<16x32xf32>
    %137 = arith.addf %134, %136 : vector<16x32xf32>
    %138 = vector.shape_cast %137 : vector<16x32xf32> to vector<2x8x32xf32>
    %c0_44 = arith.constant 0 : index
    %c0_45 = arith.constant 0 : index
    %c0_46 = arith.constant 0 : index
    %139 = vector.load %arg13[%c0_44, %c0_45, %c0_46] : memref<2x8x32xf32, #tpu.memory_space<vmem>>, vector<2x8x32xf32>
    tpu.vector_store %arg13[%c0_44, %c0_45, %c0_46], %138 {strides = array<i32>} : memref<2x8x32xf32, #tpu.memory_space<vmem>>, vector<2x8x32xf32>,
    return
  }
  func.func @transform_0(%arg0: i32) -> (i32, i32, i32) {
    %c0_i32 = arith.constant 0 : i32
    %c0_i32_0 = arith.constant 0 : i32
    %c0_i32_1 = arith.constant 0 : i32
    return %arg0, %c0_i32, %c0_i32_0 : i32, i32, i32
  }
  func.func @transform_1(%arg0: i32) -> (i32, i32) {
    %c0_i32 = arith.constant 0 : i32
    %c0_i32_0 = arith.constant 0 : i32
    %c0_i32_1 = arith.constant 0 : i32
    return %c0_i32, %c0_i32_0 : i32, i32
  }
  func.func @transform_2(%arg0: i32) -> (i32, i32) {
    %c0_i32 = arith.constant 0 : i32
    %c0_i32_0 = arith.constant 0 : i32
    %c0_i32_1 = arith.constant 0 : i32
    return %c0_i32, %c0_i32_0 : i32, i32
  }
  func.func @transform_3(%arg0: i32) -> (i32, i32) {
    %c0_i32 = arith.constant 0 : i32
    %c0_i32_0 = arith.constant 0 : i32
    %c0_i32_1 = arith.constant 0 : i32
    return %c0_i32, %c0_i32_0 : i32, i32
  }
  func.func @transform_4(%arg0: i32) -> (i32, i32) {
    %c0_i32 = arith.constant 0 : i32
    %c0_i32_0 = arith.constant 0 : i32
    %c0_i32_1 = arith.constant 0 : i32
    return %c0_i32, %c0_i32_0 : i32, i32
  }
  func.func @transform_5(%arg0: i32) -> (i32, i32) {
    %c0_i32 = arith.constant 0 : i32
    %c0_i32_0 = arith.constant 0 : i32
    %c0_i32_1 = arith.constant 0 : i32
    return %c0_i32, %c0_i32_0 : i32, i32
  }
  func.func @transform_6(%arg0: i32) -> (i32, i32) {
    %c0_i32 = arith.constant 0 : i32
    %c0_i32_0 = arith.constant 0 : i32
    %c0_i32_1 = arith.constant 0 : i32
    return %c0_i32, %c0_i32_0 : i32, i32
  }
  func.func @transform_7(%arg0: i32) -> (i32, i32) {
    %c0_i32 = arith.constant 0 : i32
    %c0_i32_0 = arith.constant 0 : i32
    %c0_i32_1 = arith.constant 0 : i32
    return %c0_i32, %c0_i32_0 : i32, i32
  }
  func.func @transform_8(%arg0: i32) -> (i32, i32) {
    %c0_i32 = arith.constant 0 : i32
    %c0_i32_0 = arith.constant 0 : i32
    %c0_i32_1 = arith.constant 0 : i32
    return %c0_i32, %c0_i32_0 : i32, i32
  }
  func.func @transform_9(%arg0: i32) -> (i32, i32) {
    %c0_i32 = arith.constant 0 : i32
    %c0_i32_0 = arith.constant 0 : i32
    %c0_i32_1 = arith.constant 0 : i32
    return %c0_i32, %c0_i32_0 : i32, i32
  }
  func.func @transform_10(%arg0: i32) -> (i32, i32) {
    %c0_i32 = arith.constant 0 : i32
    %c0_i32_0 = arith.constant 0 : i32
    %c0_i32_1 = arith.constant 0 : i32
    return %c0_i32, %c0_i32_0 : i32, i32
  }
  func.func @transform_11(%arg0: i32) -> (i32, i32) {
    %c0_i32 = arith.constant 0 : i32
    %c0_i32_0 = arith.constant 0 : i32
    %c0_i32_1 = arith.constant 0 : i32
    return %c0_i32, %c0_i32_0 : i32, i32
  }
  func.func @transform_12(%arg0: i32) -> (i32, i32, i32) {
    %c0_i32 = arith.constant 0 : i32
    %c0_i32_0 = arith.constant 0 : i32
    %c0_i32_1 = arith.constant 0 : i32
    return %arg0, %c0_i32, %c0_i32_0 : i32, i32, i32
  }
}

</mosaic_0001>

<bundles_post_ra>
// kernel: tpu_custom_call.1
= control target key start
LH: loop header
LB: loop body
LE: loop exit
PB: predicated region body
PF: predicated region fallthrough
CT: control target
= control target key end

     0   :  { %vm47_vm0 = vcmask 261120   ;;  %s2168_s0 = inlined_call_operand.vmem [shape: f32[2,8,32], index: 0, kind: input, shape index: {}]   ;;  %s2169_s1 = inlined_call_operand.vmem [shape: bf16[32,96], index: 1, kind: input, shape index: {}]   ;;  %s2170_s2 = inlined_call_operand.vmem [shape: bf16[32,32], index: 2, kind: input, shape index: {}]   ;;  %s2171_s3 = inlined_call_operand.vmem [shape: f32[1,32], index: 3, kind: input, shape index: {}]   ;;  %s2172_s4 = inlined_call_operand.vmem [shape: f32[1,32], index: 4, kind: input, shape index: {}]   ;;  %s2173_s5 = inlined_call_operand.vmem [shape: f32[1,32], index: 5, kind: input, shape index: {}]   ;;  %s2174_s6 = inlined_call_operand.vmem [shape: f32[1,32], index: 6, kind: input, shape index: {}]   ;;  %s2175_s7 = inlined_call_operand.vmem [shape: f32[1,32], index: 7, kind: input, shape index: {}]   ;;  %s2176_s8 = inlined_call_operand.vmem [shape: bf16[32,128], index: 8, kind: input, shape index: {}]   ;;  %s2177_s9 = inlined_call_operand.vmem [shape: f32[1,128], index: 9, kind: input, shape index: {}]   ;;  %s2178_s10 = inlined_call_operand.vmem [shape: bf16[128,32], index: 10, kind: input, shape index: {}]   ;;  %s2179_s11 = inlined_call_operand.vmem [shape: f32[1,32], index: 11, kind: input, shape index: {}]   ;;  %s2180_s12 = inlined_call_operand.hbm [shape: f32[2,8,32], index: 12, kind: output, shape index: {}]  }
   0x1   :  { %v43_v0 = vld [vmem:[%s2168_s0] sm:$0xff]  ;;  %v44_v1 = vld [vmem:[%s2168_s0 + $0x8] sm:$0xff] }
   0x2   :  { %v48_v2 = vsel %vm47_vm0, %v43_v0, 0.0  ;;  %v51_v3 = vsel %vm47_vm0, %v44_v1, 0.0 }
   0x3   :  { %49 = vadd.xlane.f32.xlu0 %v48_v2 }
   0x7   :  { %52 = vadd.xlane.f32.xlu0 %v51_v3 }
   0x8   :  { %17 = vsyncpa [#allocation3], 0  ;;  %v1694_v14 = vld [vmem:[%s2169_s1] sm:$0xff]   ;;  %v1772_v15 = vmov 0.0   ;;  %v1695_v16 = vld [vmem:[%s2169_s1 + $0x8] sm:$0xff]   ;;  %vm1773_vm1 = vmmov 0  }
   0x9   :  { %1512 = vmatprep.subr.bf16.mxu0 %v1772_v15  ;;  %1532 = vmatprep.subr.bf16.mxu1 %v1772_v15  ;;  %v1422_v25 = vld [vmem:[%s2172_s4] ss:$0 sm:$0xff]  ;;  %s1774_s4 = smov 112   ;;  %s1775_s13 = smov 120   ;;  %vm188_vm2 = vcmask 64512   ;;  %vm697_vm3 = vcmask 1043456  }
   0xa   :  { %1513 = vmatpush3.bf16.msra.mxu0 %v1694_v14  ;;  %1516 = vmatprep.mubr.msk.bf16.mxu0 %vm1773_vm1, %v1772_v15  ;;  %v1423_v29 = vld [vmem:[%s2173_s5] ss:$0 sm:$0xff]  ;;  %s1776_s5 = smov 104   ;;  %s1777_s14 = smov 96   ;;  %vm1103_vm5 = vcmask 130048   ;;  %vm1106_vm6 = vcmask 195584  }
   0xb   :  { %1514 = vmatprep.subr.bf16.mxu0 %v1772_v15  ;;  %1534 = vmatprep.mubr.msk.bf16.mxu1 %vm1773_vm1, %v1772_v15  ;;  %s1778_s15 = smov 64   ;;  %s1779_s16 = smov 8  }
   0xc   :  { %s1780_s21 = smov 16   ;;  %s1781_s22 = smov 24  }
   0xe   :  { %1515 = vmatpush3.bf16.msra.mxu0 %v1695_v16 }
   0xf   :  { %1520 = vmatprep.subr.bf16.mxu0 %v1772_v15 }
  0x90   :  { %v50_v4 = vpop.xlane.xlu0 %49 }
  0x91   :  { %v55_v5 = vmul.f32 0.03125, %v50_v4 }
  0x93   :  { %v57_v6 = vsub.f32 %v43_v0, %v55_v5 }
  0x94   :  { %v53_v7 = vpop.xlane.xlu0 %52 }
  0x95   :  { %v56_v8 = vmul.f32 0.03125, %v53_v7  ;;  %v59_v9 = vmul.f32 %v57_v6, %v57_v6 }
  0x97   :  { %v58_v10 = vsub.f32 %v44_v1, %v56_v8  ;;  %v61_v11 = vsel %vm47_vm0, %v59_v9, 0.0 }
  0x98   :  { %62 = vadd.xlane.f32.xlu1 %v61_v11 }
  0x99   :  { %v60_v12 = vmul.f32 %v58_v10, %v58_v10 }
  0x9b   :  { %v64_v13 = vsel %vm47_vm0, %v60_v12, 0.0 }
  0x9c   :  { %65 = vadd.xlane.f32.xlu1 %v64_v13 }
 0x125   :  { %v63_v17 = vpop.xlane.xlu1 %62 }
 0x126   :  { %v67_v18 = vmul.f32 0.03125, %v63_v17 }
 0x128   :  { %v69_v19 = vadd.f32 1e-05, %v67_v18 }
 0x129   :  { %v66_v20 = vpop.xlane.xlu1 %65 }
 0x12a   :  { %1708 = vrsqrt.f32 %v69_v19  ;;  %v68_v21 = vmul.f32 0.03125, %v66_v20 }
 0x12c   :  { %v70_v22 = vadd.f32 1e-05, %v68_v21 }
 0x12e   :  { %1710 = vrsqrt.f32 %v70_v22 }
 0x134   :  { %v1709_v23 = vpop.eup %1708 }
 0x135   :  { %v73_v24 = vmul.f32 %v1709_v23, %v57_v6 }
 0x137   :  { %v81_v28 = vmul.f32 %v1422_v25, %v73_v24 }
 0x138   :  { %v1711_v26 = vpop.eup %1710 }
 0x139   :  { %v74_v27 = vmul.f32 %v1711_v26, %v58_v10  ;;  %v89_v31 = vadd.f32 %v1423_v29, %v81_v28  ;;  %v180_v10 = vlaneseq }
 0x13b   :  { %v82_v30 = vmul.f32 %v1422_v25, %v74_v27  ;;  %v181_v11 = vshrl.u32 %v180_v10, 7  ;;  %v183_v12 = vand.u32 127, %v180_v10 }
 0x13d   :  { %v90_v32 = vadd.f32 %v1423_v29, %v82_v30  ;;  %vm1953_vm4 = vcmp.le.s32.totalorder %v183_v12, %v181_v11 }
 0x13f   :  { %v91_v33 = vpack.c.bf16 %v90_v32, %v89_v31 }
 0x141   :  { %1517 = vmatmul.mubr.msk.bf16.vlgmr.msra.gmra.mrb[0].mxu0 %vm47_vm0, %v91_v33 }
 0x142   :  { %1522 = vmatprep.mubr.msk.bf16.mxu0 %vm1773_vm1, %v1772_v15 }
 0x214   :  { %v145_v34 = vpop.f32.mrb[0].mxu0 }
 0x215   :  { %v1518_v35 = vpop.f32.mrb[1].mxu0  ;;  %v172_v40 = vpack.c.bf16 %v145_v34, %v145_v34 }
 0x216   :  { %v148_v36 = vpop.f32.mrb[2].mxu0 }
 0x217   :  { %v1519_v37 = vpop.f32.mrb[3].mxu0  ;;  %v1669_v38 = vpack.i.bf16 %v148_v36, %v145_v34  ;;  %v1882_v39 = vpack.c.bf16 %v148_v36, %v148_v36 }
 0x219   :  { %1670 = vrot.lane.b32.xlu1 %v1669_v38, %s1774_s4  ;;  %1665 = vrot.lane.b32.xlu0 %v1669_v38, %s1775_s13 }
 0x21d   :  { %1675 = vrot.lane.b32.xlu1 %v1669_v38, %s1776_s5  ;;  %236 = vrot.lane.b32.xlu0 %v1882_v39, %s1777_s14 }
 0x221   :  { %186 = vrot.lane.b32.xlu1 %v172_v40, %s1777_s14 }
 0x28b   :  { %v1671_v41 = vpop.permute.xlu1 %1670  ;;  %v1666_v42 = vpop.permute.xlu0 %1665 }
 0x28c   :  { %v1668_v43 = vunpack.i.h.bf16 %v1666_v42  ;;  %v1667_v44 = vunpack.i.l.bf16 %v1666_v42  ;;  %v1673_v45 = vunpack.i.h.bf16 %v1671_v41  ;;  %v1672_v46 = vunpack.i.l.bf16 %v1671_v41 }
 0x28e   :  { %v1885_v47 = vpack.c.bf16 %v1668_v43, %v1668_v43  ;;  %v1887_v48 = vpack.c.bf16 %v1667_v44, %v1667_v44  ;;  %v1891_v50 = vpack.c.bf16 %v1673_v45, %v1673_v45  ;;  %v1893_v51 = vpack.c.bf16 %v1672_v46, %v1672_v46 }
 0x28f   :  { %v1676_v49 = vpop.permute.xlu1 %1675  ;;  %v237_v58 = vpop.permute.xlu0 %236 }
 0x290   :  { %285 = vrot.lane.b32.xlu1 %v1887_v48, %s1777_s14  ;;  %334 = vrot.lane.b32.xlu0 %v1885_v47, %s1777_s14  ;;  %v1678_v52 = vunpack.i.h.bf16 %v1676_v49  ;;  %v1677_v53 = vunpack.i.l.bf16 %v1676_v49  ;;  %v242_v59 = vsel %vm188_vm2, %v237_v58, 0 }
 0x292   :  { %v1898_v56 = vpack.c.bf16 %v1678_v52, %v1678_v52  ;;  %v1900_v57 = vpack.c.bf16 %v1677_v53, %v1677_v53 }
 0x293   :  { %v187_v54 = vpop.permute.xlu1 %186 }
 0x294   :  { %v193_v55 = vsel %vm188_vm2, %v187_v54, 0  ;;  %383 = vrot.lane.b32.xlu1 %v1893_v51, %s1777_s14  ;;  %432 = vrot.lane.b32.xlu0 %v1891_v50, %s1777_s14 }
 0x295   :  { %1521 = vmatpush3.bf16.xpose.msra.mxu0 %v193_v55 }
 0x296   :  { %1526 = vmatprep.subr.bf16.mxu0 %v1772_v15 }
 0x298   :  { %481 = vrot.lane.b32.xlu1 %v1900_v57, %s1777_s14  ;;  %530 = vrot.lane.b32.xlu0 %v1898_v56, %s1777_s14 }
 0x29c   :  { %1523 = vmatmul.mubr.msk.bf16.vlgmr.msra.gmra.mrb[4].mxu0 %vm188_vm2, %v172_v40  ;;  %692 = vrot.lane.b32.xlu1 %v172_v40, %s1778_s15 }
 0x29d   :  { %1527 = vmatpush3.bf16.xpose.msra.mxu0 %v242_v59  ;;  %1528 = vmatprep.mubr.msk.bf16.mxu0 %vm1773_vm1, %v1772_v15 }
 0x29e   :  { %1538 = vmatprep.subr.bf16.mxu0 %v1772_v15 }
 0x2a4   :  { %1529 = vmatmul.mubr.msk.bf16.vlgmr.msra.gmra.mrb[8].mxu0 %vm188_vm2, %v1882_v39 }
 0x2a5   :  { %1540 = vmatprep.mubr.msk.bf16.mxu0 %vm1773_vm1, %v1772_v15 }
 0x302   :  { %v286_v60 = vpop.permute.xlu1 %285  ;;  %v335_v61 = vpop.permute.xlu0 %334 }
 0x303   :  { %v340_v62 = vsel %vm188_vm2, %v335_v61, 0  ;;  %v291_v63 = vsel %vm188_vm2, %v286_v60, 0 }
 0x304   :  { %1533 = vmatpush3.bf16.xpose.msra.mxu1 %v291_v63  ;;  %1539 = vmatpush3.bf16.xpose.msra.mxu0 %v340_v62 }
 0x305   :  { %1544 = vmatprep.subr.bf16.mxu1 %v1772_v15  ;;  %1550 = vmatprep.subr.bf16.mxu0 %v1772_v15 }
 0x306   :  { %v384_v0 = vpop.permute.xlu1 %383  ;;  %v433_v1 = vpop.permute.xlu0 %432 }
 0x307   :  { %v389_v2 = vsel %vm188_vm2, %v384_v0, 0  ;;  %v438_v3 = vsel %vm188_vm2, %v433_v1, 0 }
 0x30a   :  { %v482_v4 = vpop.permute.xlu1 %481  ;;  %v531_v5 = vpop.permute.xlu0 %530 }
 0x30b   :  { %1535 = vmatmul.mubr.msk.bf16.vlgmr.msra.gmra.mrb[0].mxu1 %vm188_vm2, %v1887_v48  ;;  %1541 = vmatmul.mubr.msk.bf16.vlgmr.msra.gmra.mrb[12].mxu0 %vm188_vm2, %v1885_v47  ;;  %v487_v6 = vsel %vm188_vm2, %v482_v4, 0  ;;  %v536_v7 = vsel %vm188_vm2, %v531_v5, 0 }
 0x30c   :  { %1545 = vmatpush3.bf16.xpose.msra.mxu1 %v389_v2  ;;  %1551 = vmatpush3.bf16.xpose.msra.mxu0 %v438_v3 }
 0x30d   :  { %1546 = vmatprep.mubr.msk.bf16.mxu1 %vm1773_vm1, %v1772_v15  ;;  %1552 = vmatprep.mubr.msk.bf16.mxu0 %vm1773_vm1, %v1772_v15 }
 0x30e   :  { %1556 = vmatprep.subr.bf16.mxu1 %v1772_v15  ;;  %1562 = vmatprep.subr.bf16.mxu0 %v1772_v15  ;;  %v693_v8 = vpop.permute.xlu1 %692 }
 0x30f   :  { %v699_v9 = vsel %vm697_vm3, %v693_v8, 0 }
 0x313   :  { %1547 = vmatmul.mubr.msk.bf16.vlgmr.msra.gmra.mrb[4].mxu1 %vm188_vm2, %v1893_v51  ;;  %1553 = vmatmul.mubr.msk.bf16.vlgmr.msra.gmra.mrb[16].mxu0 %vm188_vm2, %v1891_v50 }
 0x314   :  { %1557 = vmatpush3.bf16.xpose.msra.mxu1 %v487_v6  ;;  %1563 = vmatpush3.bf16.xpose.msra.mxu0 %v536_v7 }
 0x315   :  { %1558 = vmatprep.mubr.msk.bf16.mxu1 %vm1773_vm1, %v1772_v15  ;;  %1564 = vmatprep.mubr.msk.bf16.mxu0 %vm1773_vm1, %v1772_v15 }
 0x316   :  { %1568 = vmatprep.subr.bf16.mxu1 %v1772_v15  ;;  %1574 = vmatprep.subr.bf16.mxu0 %v1772_v15 }
 0x31b   :  { %1559 = vmatmul.mubr.msk.bf16.vlgmr.msra.gmra.mrb[8].mxu1 %vm188_vm2, %v1900_v57  ;;  %1565 = vmatmul.mubr.msk.bf16.vlgmr.msra.gmra.mrb[20].mxu0 %vm188_vm2, %v1898_v56 }
 0x31c   :  { %1569 = vmatpush3.bf16.msra.mxu1 %v699_v9  ;;  %1576 = vmatprep.mubr.msk.bf16.mxu0 %vm1773_vm1, %v1772_v15 }
 0x31d   :  { %1570 = vmatprep.mubr.msk.bf16.mxu1 %vm1773_vm1, %v1772_v15  ;;  %1580 = vmatprep.subr.bf16.mxu1 %v1772_v15 }
 0x36f   :  { %v229_v13 = vpop.f32.mrb[4].mxu0 }
 0x370   :  { %v578_v16 = vmul.f32 0.35355338, %v229_v13  ;;  %v1524_v17 = vpop.f32.mrb[5].mxu0 }
 0x371   :  { %v232_v18 = vpop.f32.mrb[6].mxu0 }
 0x372   :  { %v1525_v19 = vpop.f32.mrb[7].mxu0  ;;  %v1959_v20 = vsel %vm1953_vm4, %v578_v16, -1e+30 }
 0x373   :  { %v596_v21 = vsel %vm188_vm2, %v1959_v20, -inf }
 0x374   :  { %597 = vmax.xlane.f32.xlu1 %v596_v21 }
 0x377   :  { %v278_v22 = vpop.f32.mrb[8].mxu0 }
 0x378   :  { %v579_v23 = vmul.f32 0.35355338, %v278_v22  ;;  %v1530_v24 = vpop.f32.mrb[9].mxu0 }
 0x379   :  { %v281_v25 = vpop.f32.mrb[10].mxu0 }
 0x37a   :  { %v1531_v26 = vpop.f32.mrb[11].mxu0  ;;  %v589_v27 = vsel %vm1953_vm4, %v579_v23, -1e+30 }
 0x37b   :  { %v599_v28 = vsel %vm188_vm2, %v589_v27, -inf }
 0x37c   :  { %600 = vmax.xlane.f32.xlu0 %v599_v28 }
 0x3de   :  { %v327_v29 = vpop.f32.mrb[0].mxu1  ;;  %v376_v30 = vpop.f32.mrb[12].mxu0 }
 0x3df   :  { %v580_v31 = vmul.f32 0.35355338, %v327_v29  ;;  %v581_v32 = vmul.f32 0.35355338, %v376_v30  ;;  %v1536_v33 = vpop.f32.mrb[1].mxu1  ;;  %v1542_v34 = vpop.f32.mrb[13].mxu0 }
 0x3e0   :  { %v330_v35 = vpop.f32.mrb[2].mxu1  ;;  %v379_v36 = vpop.f32.mrb[14].mxu0 }
 0x3e1   :  { %v1537_v37 = vpop.f32.mrb[3].mxu1  ;;  %v1543_v38 = vpop.f32.mrb[15].mxu0  ;;  %v590_v40 = vsel %vm1953_vm4, %v580_v31, -1e+30  ;;  %v591_v42 = vsel %vm1953_vm4, %v581_v32, -1e+30 }
 0x3e2   :  { %v602_v41 = vsel %vm188_vm2, %v590_v40, -inf  ;;  %v605_v45 = vsel %vm188_vm2, %v591_v42, -inf }
 0x3e3   :  { %603 = vmax.xlane.f32.xlu0 %v602_v41 }
 0x3e6   :  { %v425_v43 = vpop.f32.mrb[4].mxu1  ;;  %v474_v44 = vpop.f32.mrb[16].mxu0 }
 0x3e7   :  { %v582_v46 = vmul.f32 0.35355338, %v425_v43  ;;  %v583_v49 = vmul.f32 0.35355338, %v474_v44  ;;  %v1548_v52 = vpop.f32.mrb[5].mxu1  ;;  %606 = vmax.xlane.f32.xlu0 %v605_v45  ;;  %v1554_v53 = vpop.f32.mrb[17].mxu0 }
 0x3e8   :  { %v428_v54 = vpop.f32.mrb[6].mxu1  ;;  %v477_v55 = vpop.f32.mrb[18].mxu0 }
 0x3e9   :  { %v1549_v58 = vpop.f32.mrb[7].mxu1  ;;  %v1555_v59 = vpop.f32.mrb[19].mxu0  ;;  %v592_v60 = vsel %vm1953_vm4, %v582_v46, -1e+30  ;;  %v1976_v61 = vsel %vm1953_vm4, %v583_v49, -1e+30 }
 0x3ea   :  { %v608_v62 = vsel %vm188_vm2, %v592_v60, -inf  ;;  %v611_v63 = vsel %vm188_vm2, %v1976_v61, -inf }
 0x3eb   :  { %609 = vmax.xlane.f32.xlu1 %v608_v62  ;;  %612 = vmax.xlane.f32.xlu0 %v611_v63 }
 0x3ee   :  { %v523_v0 = vpop.f32.mrb[8].mxu1  ;;  %v572_v1 = vpop.f32.mrb[20].mxu0 }
 0x3ef   :  { %v584_v2 = vmul.f32 0.35355338, %v523_v0  ;;  %v585_v3 = vmul.f32 0.35355338, %v572_v1  ;;  %v1560_v4 = vpop.f32.mrb[9].mxu1  ;;  %v1566_v5 = vpop.f32.mrb[21].mxu0 }
 0x3f0   :  { %v526_v6 = vpop.f32.mrb[10].mxu1  ;;  %v575_v7 = vpop.f32.mrb[22].mxu0 }
 0x3f1   :  { %v1561_v8 = vpop.f32.mrb[11].mxu1  ;;  %v1567_v9 = vpop.f32.mrb[23].mxu0  ;;  %v594_v10 = vsel %vm1953_vm4, %v584_v2, -1e+30  ;;  %v1985_v11 = vsel %vm1953_vm4, %v585_v3, -1e+30 }
 0x3f2   :  { %v614_v12 = vsel %vm188_vm2, %v594_v10, -inf  ;;  %v617_v13 = vsel %vm188_vm2, %v1985_v11, -inf }
 0x3f3   :  { %615 = vmax.xlane.f32.xlu1 %v614_v12  ;;  %618 = vmax.xlane.f32.xlu0 %v617_v13 }
 0x401   :  { %v598_v17 = vpop.xlane.xlu1 %597 }
 0x402   :  { %v620_v18 = vsub.f32 %v1959_v20, %v598_v17 }
 0x404   :  { %789 = vrot.lane.b32.xlu1 %v1887_v48, %s1778_s15  ;;  %v628_v21 = vmul.f32 1.442695, %v620_v18 }
 0x408   :  { %837 = vrot.lane.b32.xlu1 %v1885_v47, %s1778_s15 }
 0x409   :  { %741 = vrot.lane.b32.xlu0 %v1882_v39, %s1778_s15  ;;  %v601_v16 = vpop.xlane.xlu0 %600 }
 0x40a   :  { %v621_v14 = vsub.f32 %v589_v27, %v601_v16 }
 0x40c   :  { %v630_v19 = vmul.f32 1.442695, %v621_v14 }
 0x40e   :  { %1712 = vpow2.f32 %v630_v19 }
 0x40f   :  { %1714 = vpow2.f32 %v628_v21 }
 0x418   :  { %v1713_v22 = vpop.eup %1712 }
 0x419   :  { %v647_v23 = vsel %vm188_vm2, %v1713_v22, 0.0  ;;  %v1998_v24 = vpop.eup %1714 }
 0x41a   :  { %v644_v47 = vsel %vm188_vm2, %v1998_v24, 0.0 }
 0x428   :  { %648 = vadd.xlane.f32.xlu0 %v647_v23 }
 0x42c   :  { %645 = vadd.xlane.f32.xlu1 %v644_v47 }
 0x43d   :  { %885 = vrot.lane.b32.xlu1 %v1893_v51, %s1778_s15 }
 0x470   :  { %v604_v39 = vpop.xlane.xlu0 %603 }
 0x471   :  { %v622_v48 = vsub.f32 %v590_v40, %v604_v39 }
 0x473   :  { %v632_v20 = vmul.f32 1.442695, %v622_v48 }
 0x474   :  { %v607_v25 = vpop.xlane.xlu0 %606 }
 0x475   :  { %1716 = vpow2.f32 %v632_v20  ;;  %v623_v26 = vsub.f32 %v591_v42, %v607_v25 }
 0x477   :  { %v634_v27 = vmul.f32 1.442695, %v623_v26 }
 0x478   :  { %v610_v28 = vpop.xlane.xlu1 %609  ;;  %v613_v31 = vpop.xlane.xlu0 %612 }
 0x479   :  { %1718 = vpow2.f32 %v634_v27  ;;  %v624_v29 = vsub.f32 %v592_v60, %v610_v28  ;;  %v625_v46 = vsub.f32 %v1976_v61, %v613_v31 }
 0x47b   :  { %v636_v30 = vmul.f32 1.442695, %v624_v29  ;;  %v638_v49 = vmul.f32 1.442695, %v625_v46 }
 0x47d   :  { %1720 = vpow2.f32 %v636_v30 }
 0x47f   :  { %v2004_v32 = vpop.eup %1716 }
 0x480   :  { %v616_v33 = vpop.xlane.xlu1 %615  ;;  %v619_v34 = vpop.xlane.xlu0 %618  ;;  %v650_v51 = vsel %vm188_vm2, %v2004_v32, 0.0 }
 0x481   :  { %v626_v35 = vsub.f32 %v594_v10, %v616_v33  ;;  %651 = vadd.xlane.f32.xlu1 %v650_v51  ;;  %v627_v52 = vsub.f32 %v1985_v11, %v619_v34 }
 0x483   :  { %v2008_v36 = vpop.eup %1718  ;;  %v640_v37 = vmul.f32 1.442695, %v626_v35  ;;  %v642_v53 = vmul.f32 1.442695, %v627_v52 }
 0x484   :  { %v742_v38 = vpop.permute.xlu0 %741  ;;  %v653_v40 = vsel %vm188_vm2, %v2008_v36, 0.0  ;;  %v790_v54 = vpop.permute.xlu1 %789 }
 0x485   :  { %1722 = vpow2.f32 %v640_v37  ;;  %v747_v41 = vsel %vm697_vm3, %v742_v38, 0  ;;  %654 = vadd.xlane.f32.xlu0 %v653_v40  ;;  %v795_v5 = vsel %vm697_vm3, %v790_v54, 0 }
 0x486   :  { %1575 = vmatpush3.bf16.msra.mxu0 %v747_v41  ;;  %1724 = vpow2.f32 %v638_v49 }
 0x487   :  { %v2013_v42 = vpop.eup %1720  ;;  %1586 = vmatprep.subr.bf16.mxu0 %v1772_v15  ;;  %1726 = vpow2.f32 %v642_v53 }
 0x488   :  { %v656_v43 = vsel %vm188_vm2, %v2013_v42, 0.0  ;;  %v838_v55 = vpop.permute.xlu1 %837 }
 0x489   :  { %657 = vadd.xlane.f32.xlu1 %v656_v43  ;;  %v843_v2 = vsel %vm697_vm3, %v838_v55, 0 }
 0x48f   :  { %v2018_v44 = vpop.eup %1722 }
 0x490   :  { %v662_v45 = vsel %vm188_vm2, %v2018_v44, 0.0  ;;  %v2028_v59 = vpop.eup %1724 }
 0x491   :  { %663 = vadd.xlane.f32.xlu1 %v662_v45  ;;  %v2032_v62 = vpop.eup %1726 }
 0x49b   :  { %933 = vrot.lane.b32.xlu0 %v1891_v50, %s1778_s15  ;;  %v659_v50 = vsel %vm188_vm2, %v2028_v59, 0.0 }
 0x4a2   :  { %981 = vrot.lane.b32.xlu1 %v1900_v57, %s1778_s15  ;;  %v665_v57 = vsel %vm188_vm2, %v2032_v62, 0.0 }
 0x4b5   :  { %v649_v58 = vpop.xlane.xlu0 %648 }
 0x4b6   :  { %1728 = vrcp.f32 %v649_v58 }
 0x4b9   :  { %v646_v60 = vpop.xlane.xlu1 %645 }
 0x4ba   :  { %1730 = vrcp.f32 %v646_v60  ;;  %660 = vadd.xlane.f32.xlu0 %v659_v50 }
 0x4bd   :  { %v886_v6 = vpop.permute.xlu1 %885 }
 0x4be   :  { %666 = vadd.xlane.f32.xlu0 %v665_v57  ;;  %v891_v16 = vsel %vm697_vm3, %v886_v6, 0 }
 0x4c0   :  { %v1729_v61 = vpop.eup %1728 }
 0x4c1   :  { %v677_v63 = vmul.f32 %v1729_v61, %v1713_v22 }
 0x4c3   :  { %v685_v0 = vpack.c.bf16 %v677_v63, %v677_v63 }
 0x4c4   :  { %v1731_v1 = vpop.eup %1730 }
 0x4c5   :  { %v676_v3 = vmul.f32 %v1731_v1, %v1998_v24  ;;  %1577 = vmatmul.mubr.msk.bf16.vlgmr.msra.gmra.mrb[24].mxu0 %vm188_vm2, %v685_v0  ;;  %v1696_v0 = vld [vmem:[%s2170_s2] sm:$0xff]   ;;  %v1697_v1 = vld [vmem:[%s2170_s2 + $0x8] sm:$0xff]  }
 0x4c6   :  { %1587 = vmatpush3.bf16.msra.mxu0 %v843_v2  ;;  %1588 = vmatprep.mubr.msk.bf16.mxu0 %vm1773_vm1, %v1772_v15 }
 0x4c7   :  { %v684_v4 = vpack.c.bf16 %v676_v3, %v676_v3  ;;  %1598 = vmatprep.subr.bf16.mxu0 %v1772_v15 }
 0x4c9   :  { %1571 = vmatmul.mubr.msk.bf16.vlgmr.msra.gmra.mrb[12].mxu1 %vm188_vm2, %v684_v4 }
 0x4ca   :  { %1581 = vmatpush3.bf16.msra.mxu1 %v795_v5  ;;  %1582 = vmatprep.mubr.msk.bf16.mxu1 %vm1773_vm1, %v1772_v15 }
 0x4cb   :  { %1592 = vmatprep.subr.bf16.mxu1 %v1772_v15 }
 0x4d4   :  { %1029 = vrot.lane.b32.xlu0 %v1898_v56, %s1778_s15 }
 0x50e   :  { %v652_v7 = vpop.xlane.xlu1 %651 }
 0x50f   :  { %1732 = vrcp.f32 %v652_v7 }
 0x512   :  { %v655_v8 = vpop.xlane.xlu0 %654 }
 0x513   :  { %1734 = vrcp.f32 %v655_v8 }
 0x516   :  { %v658_v9 = vpop.xlane.xlu1 %657  ;;  %v934_v56 = vpop.permute.xlu0 %933 }
 0x517   :  { %1736 = vrcp.f32 %v658_v9  ;;  %v939_v22 = vsel %vm697_vm3, %v934_v56, 0 }
 0x519   :  { %v1733_v10 = vpop.eup %1732 }
 0x51a   :  { %v678_v11 = vmul.f32 %v1733_v10, %v2004_v32 }
 0x51c   :  { %v686_v12 = vpack.c.bf16 %v678_v11, %v678_v11 }
 0x51d   :  { %v1735_v13 = vpop.eup %1734 }
 0x51e   :  { %v679_v14 = vmul.f32 %v1735_v13, %v2008_v36  ;;  %1583 = vmatmul.mubr.msk.bf16.vlgmr.msra.gmra.mrb[16].mxu1 %vm188_vm2, %v686_v12  ;;  %v664_v17 = vpop.xlane.xlu1 %663 }
 0x51f   :  { %1593 = vmatpush3.bf16.msra.mxu1 %v891_v16  ;;  %1738 = vrcp.f32 %v664_v17  ;;  %1594 = vmatprep.mubr.msk.bf16.mxu1 %vm1773_vm1, %v1772_v15 }
 0x520   :  { %v687_v18 = vpack.c.bf16 %v679_v14, %v679_v14  ;;  %1604 = vmatprep.subr.bf16.mxu1 %v1772_v15 }
 0x521   :  { %v1737_v19 = vpop.eup %1736 }
 0x522   :  { %v680_v21 = vmul.f32 %v1737_v19, %v2013_v42  ;;  %1589 = vmatmul.mubr.msk.bf16.vlgmr.msra.gmra.mrb[28].mxu0 %vm188_vm2, %v687_v18  ;;  %v982_v23 = vpop.permute.xlu1 %981 }
 0x523   :  { %1599 = vmatpush3.bf16.msra.mxu0 %v939_v22  ;;  %1600 = vmatprep.mubr.msk.bf16.mxu0 %vm1773_vm1, %v1772_v15  ;;  %v987_v47 = vsel %vm697_vm3, %v982_v23, 0 }
 0x524   :  { %v688_v24 = vpack.c.bf16 %v680_v21, %v680_v21  ;;  %1610 = vmatprep.subr.bf16.mxu0 %v1772_v15 }
 0x526   :  { %1595 = vmatmul.mubr.msk.bf16.vlgmr.msra.gmra.mrb[20].mxu1 %vm188_vm2, %v688_v24 }
 0x527   :  { %1605 = vmatpush3.bf16.msra.mxu1 %v987_v47  ;;  %1606 = vmatprep.mubr.msk.bf16.mxu1 %vm1773_vm1, %v1772_v15 }
 0x528   :  { %1616 = vmatprep.subr.bf16.mxu1 %v1772_v15 }
 0x529   :  { %v1739_v39 = vpop.eup %1738 }
 0x52a   :  { %v682_v48 = vmul.f32 %v1739_v39, %v2018_v44 }
 0x52c   :  { %v690_v20 = vpack.c.bf16 %v682_v48, %v682_v48 }
 0x52e   :  { %1607 = vmatmul.mubr.msk.bf16.vlgmr.msra.gmra.mrb[24].mxu1 %vm188_vm2, %v690_v20 }
 0x52f   :  { %1620 = vmatprep.mubr.msk.bf16.mxu1 %vm1773_vm1, %v1772_v15  ;;  %1617 = vmatpush3.bf16.msra.mxu1 %v1696_v0  ;;  %v1447_v0 = vld [vmem:[%s2174_s6] ss:$0 sm:$0xff] }
 0x530   :  { %1618 = vmatprep.subr.bf16.mxu1 %v1772_v15 }
 0x533   :  { %1619 = vmatpush3.bf16.msra.mxu1 %v1697_v1 }
 0x534   :  { %1632 = vmatprep.subr.bf16.mxu1 %v1772_v15 }
 0x547   :  { %v661_v25 = vpop.xlane.xlu0 %660 }
 0x548   :  { %1740 = vrcp.f32 %v661_v25  ;;  %v1443_v25 = vld [vmem:[%s2171_s3] ss:$0 sm:$0xff] }
 0x54b   :  { %v667_v26 = vpop.xlane.xlu0 %666 }
 0x54c   :  { %1742 = vrcp.f32 %v667_v26 }
 0x54f   :  { %v1030_v29 = vpop.permute.xlu0 %1029 }
 0x550   :  { %v1035_v32 = vsel %vm697_vm3, %v1030_v29, 0 }
 0x552   :  { %v1741_v27 = vpop.eup %1740 }
 0x553   :  { %v681_v28 = vmul.f32 %v1741_v27, %v2028_v59 }
 0x555   :  { %v689_v30 = vpack.c.bf16 %v681_v28, %v681_v28 }
 0x556   :  { %v1743_v31 = vpop.eup %1742 }
 0x557   :  { %1601 = vmatmul.mubr.msk.bf16.vlgmr.msra.gmra.mrb[32].mxu0 %vm188_vm2, %v689_v30  ;;  %v683_v33 = vmul.f32 %v1743_v31, %v2032_v62 }
 0x558   :  { %1611 = vmatpush3.bf16.msra.mxu0 %v1035_v32  ;;  %1612 = vmatprep.mubr.msk.bf16.mxu0 %vm1773_vm1, %v1772_v15 }
 0x559   :  { %1624 = vmatprep.subr.bf16.mxu0 %v1772_v15  ;;  %v691_v34 = vpack.c.bf16 %v683_v33, %v683_v33 }
 0x55f   :  { %1613 = vmatmul.mubr.msk.bf16.vlgmr.msra.gmra.mrb[36].mxu0 %vm188_vm2, %v691_v34 }
 0x560   :  { %1628 = vmatprep.mubr.msk.bf16.mxu0 %vm1773_vm1, %v1772_v15 }
 0x598   :  { %v783_v51 = vpop.f32.mrb[24].mxu0 }
 0x599   :  { %v1578_v35 = vpop.f32.mrb[25].mxu0 }
 0x59a   :  { %v786_v36 = vpop.f32.mrb[26].mxu0 }
 0x59b   :  { %v1579_v37 = vpop.f32.mrb[27].mxu0 }
 0x59c   :  { %v735_v38 = vpop.f32.mrb[12].mxu1 }
 0x59d   :  { %v1572_v40 = vpop.f32.mrb[13].mxu1 }
 0x59e   :  { %v738_v41 = vpop.f32.mrb[14].mxu1 }
 0x59f   :  { %v1573_v42 = vpop.f32.mrb[15].mxu1 }
 0x5f1   :  { %v831_v43 = vpop.f32.mrb[16].mxu1 }
 0x5f2   :  { %v1584_v44 = vpop.f32.mrb[17].mxu1 }
 0x5f3   :  { %v834_v45 = vpop.f32.mrb[18].mxu1  ;;  %v1698_v44 = vld [vmem:[%s2176_s8] sm:$0xff]  }
 0x5f4   :  { %v1585_v46 = vpop.f32.mrb[19].mxu1  ;;  %1625 = vmatpush3.bf16.msra.mxu0 %v1698_v44  ;;  %v1699_v45 = vld [vmem:[%s2176_s8 + $0x8] sm:$0xff]  }
 0x5f5   :  { %v879_v49 = vpop.f32.mrb[28].mxu0  ;;  %1626 = vmatprep.subr.bf16.mxu0 %v1772_v15  ;;  %v1700_v46 = vld [vmem:[%s2178_s10] sm:$0xff]  }
 0x5f6   :  { %v1679_v52 = vpack.i.bf16 %v879_v49, %v831_v43  ;;  %v1590_v53 = vpop.f32.mrb[29].mxu0  ;;  %v1701_v49 = vld [vmem:[%s2178_s10 + $0x8] sm:$0xff]  }
 0x5f7   :  { %v882_v54 = vpop.f32.mrb[30].mxu0  ;;  %v1703_v53 = vld [vmem:[%s2178_s10 + $0x18] sm:$0xff]  }
 0x5f8   :  { %1680 = vrot.lane.b32.xlu1 %v1679_v52, %s1779_s16  ;;  %v1591_v55 = vpop.f32.mrb[31].mxu0  ;;  %1627 = vmatpush3.bf16.msra.mxu0 %v1699_v45  ;;  %v1702_v52 = vld [vmem:[%s2178_s10 + $0x10] sm:$0xff]   ;;  %v1704_v54 = vld [vmem:[%s2178_s10 + $0x20] sm:$0xff]  }
 0x5f9   :  { %v927_v58 = vpop.f32.mrb[20].mxu1  ;;  %v1705_v55 = vld [vmem:[%s2178_s10 + $0x28] sm:$0xff]  }
 0x5fa   :  { %v1596_v59 = vpop.f32.mrb[21].mxu1 }
 0x5fb   :  { %v930_v60 = vpop.f32.mrb[22].mxu1 }
 0x5fc   :  { %v1597_v50 = vpop.f32.mrb[23].mxu1 }
 0x601   :  { %v1023_v62 = vpop.f32.mrb[24].mxu1 }
 0x602   :  { %v1608_v57 = vpop.f32.mrb[25].mxu1 }
 0x603   :  { %v1026_v61 = vpop.f32.mrb[26].mxu1 }
 0x604   :  { %v1609_v63 = vpop.f32.mrb[27].mxu1 }
 0x62a   :  { %v975_v2 = vpop.f32.mrb[32].mxu0 }
 0x62b   :  { %v1684_v3 = vpack.i.bf16 %v975_v2, %v927_v58  ;;  %v1602_v4 = vpop.f32.mrb[33].mxu0 }
 0x62c   :  { %v978_v5 = vpop.f32.mrb[34].mxu0  ;;  %v1448_v4 = vld [vmem:[%s2175_s7] ss:$0 sm:$0xff] }
 0x62d   :  { %1685 = vrot.lane.b32.xlu0 %v1684_v3, %s1780_s21  ;;  %v1603_v6 = vpop.f32.mrb[35].mxu0 }
 0x632   :  { %v1071_v7 = vpop.f32.mrb[36].mxu0 }
 0x633   :  { %v1689_v8 = vpack.i.bf16 %v1071_v7, %v1023_v62  ;;  %v1614_v9 = vpop.f32.mrb[37].mxu0 }
 0x634   :  { %v1074_v10 = vpop.f32.mrb[38].mxu0  ;;  %v1706_v9 = vld [vmem:[%s2178_s10 + $0x30] sm:$0xff]  }
 0x635   :  { %1690 = vrot.lane.b32.xlu1 %v1689_v8, %s1781_s22  ;;  %v1615_v11 = vpop.f32.mrb[39].mxu0  ;;  %v1707_v10 = vld [vmem:[%s2178_s10 + $0x38] sm:$0xff]   ;;  %s1782_s10 = smov [#allocation2]  }
 0x636   :  { %v1449_v11 = vld [vmem:[%s2177_s9] ss:$0 sm:$0xff]  ;;  %s1411_s0 = sshll.u32 %s1782_s10, 4  ;;  %s1412_s0 = int_to_ptr.vmem [resolvable:$true] %s1411_s0 }
 0x637   :  { %s1748_s9 = scalar_lea.vmem %s1412_s0, 256  ;;  %p1753_p1 = scmp.lt.s32.totalorder %s1412_s0, %s1412_s0 }
 0x638   :  { %p1749_p0 = scmp.ne.s32.totalorder %s1412_s0, %s1748_s9  ;;  %p1754_p2 = scmp.lt.s32.totalorder %s1748_s9, %s1748_s9 }
 0x63a   :  { %p1755_p3 = por %p1754_p2, %p1753_p1 }
 0x63c   :  { %p1756_p4 = pnand %p1755_p3, %p1749_p0 }
 0x66a   :  { %v1681_v12 = vpop.permute.xlu1 %1680 }
 0x66b   :  { %v1683_v16 = vunpack.i.h.bf16 %v1681_v12  ;;  %v1682_v14 = vunpack.i.l.bf16 %v1681_v12 }
 0x66d   :  { %v1102_v19 = vsel %vm188_vm2, %v783_v51, %v1683_v16  ;;  %v1101_v21 = vsel %vm188_vm2, %v735_v38, %v1682_v14 }
 0x69f   :  { %v1686_v13 = vpop.permute.xlu0 %1685 }
 0x6a0   :  { %v1688_v17 = vunpack.i.h.bf16 %v1686_v13  ;;  %v1687_v56 = vunpack.i.l.bf16 %v1686_v13 }
 0x6a2   :  { %v1105_v24 = vsel %vm1103_vm5, %v1102_v19, %v1688_v17  ;;  %v1104_v47 = vsel %vm1103_vm5, %v1101_v21, %v1687_v56 }
 0x6a7   :  { %v1691_v18 = vpop.permute.xlu1 %1690 }
 0x6a8   :  { %v1693_v22 = vunpack.i.h.bf16 %v1691_v18  ;;  %v1692_v23 = vunpack.i.l.bf16 %v1691_v18 }
 0x6aa   :  { %v1108_v39 = vsel %vm1106_vm6, %v1105_v24, %v1693_v22  ;;  %v1107_v48 = vsel %vm1106_vm6, %v1104_v47, %v1692_v23 }
 0x6ab   :  { %v1109_v20 = vpack.c.bf16 %v1108_v39, %v1107_v48 }
 0x6ad   :  { %1621 = vmatmul.mubr.msk.bf16.vlgmr.msra.gmra.mrb[28].mxu1 %vm47_vm0, %v1109_v20 }
 0x6ae   :  { %1648 = vmatprep.mubr.msk.bf16.mxu1 %vm1773_vm1, %v1772_v15  ;;  %1633 = vmatpush3.bf16.msra.mxu1 %v1700_v46 }
 0x6af   :  { %1634 = vmatprep.subr.bf16.mxu1 %v1772_v15 }
 0x6b2   :  { %1635 = vmatpush3.bf16.msra.mxu1 %v1701_v49 }
 0x6b3   :  { %1636 = vmatprep.subr.bf16.mxu1 %v1772_v15 }
 0x6b6   :  { %1637 = vmatpush3.bf16.msra.mxu1 %v1702_v52 }
 0x6b7   :  { %1638 = vmatprep.subr.bf16.mxu1 %v1772_v15 }
 0x6ba   :  { %1639 = vmatpush3.bf16.msra.mxu1 %v1703_v53 }
 0x6bb   :  { %1640 = vmatprep.subr.bf16.mxu1 %v1772_v15 }
 0x6be   :  { %1641 = vmatpush3.bf16.msra.mxu1 %v1704_v54 }
 0x6bf   :  { %1642 = vmatprep.subr.bf16.mxu1 %v1772_v15 }
 0x6c2   :  { %1643 = vmatpush3.bf16.msra.mxu1 %v1705_v55 }
 0x6c3   :  { %1644 = vmatprep.subr.bf16.mxu1 %v1772_v15 }
 0x6c6   :  { %1645 = vmatpush3.bf16.msra.mxu1 %v1706_v9 }
 0x6c7   :  { %1646 = vmatprep.subr.bf16.mxu1 %v1772_v15  ;;  %v1453_v15 = vld [vmem:[%s2179_s11] ss:$0 sm:$0xff] }
 0x6ca   :  { %1647 = vmatpush3.bf16.msra.mxu1 %v1707_v10 }
 0x780   :  { %v1170_v26 = vpop.f32.mrb[28].mxu1 }
 0x781   :  { %v1171_v27 = vadd.f32 %v1443_v25, %v1170_v26  ;;  %v1622_v28 = vpop.f32.mrb[29].mxu1 }
 0x782   :  { %v1173_v29 = vpop.f32.mrb[30].mxu1 }
 0x783   :  { %v1174_v30 = vadd.f32 %v1443_v25, %v1173_v29  ;;  %v1623_v31 = vpop.f32.mrb[31].mxu1  ;;  %v1179_v32 = vsel %vm47_vm0, %v1171_v27, 0.0 }
 0x784   :  { %1180 = vadd.xlane.f32.xlu0 %v1179_v32 }
 0x785   :  { %v1182_v33 = vsel %vm47_vm0, %v1174_v30, 0.0 }
 0x786   :  { %1183 = vadd.xlane.f32.xlu1 %v1182_v33 }
 0x811   :  { %v1181_v34 = vpop.xlane.xlu0 %1180 }
 0x812   :  { %v1185_v51 = vmul.f32 0.03125, %v1181_v34 }
 0x813   :  { %v1184_v35 = vpop.xlane.xlu1 %1183 }
 0x814   :  { %v1187_v36 = vsub.f32 %v1171_v27, %v1185_v51  ;;  %v1186_v37 = vmul.f32 0.03125, %v1184_v35 }
 0x816   :  { %v1188_v38 = vsub.f32 %v1174_v30, %v1186_v37  ;;  %v1189_v40 = vmul.f32 %v1187_v36, %v1187_v36 }
 0x818   :  { %v1191_v41 = vsel %vm47_vm0, %v1189_v40, 0.0  ;;  %v1190_v42 = vmul.f32 %v1188_v38, %v1188_v38 }
 0x819   :  { %1192 = vadd.xlane.f32.xlu0 %v1191_v41 }
 0x81a   :  { %v1194_v43 = vsel %vm47_vm0, %v1190_v42, 0.0 }
 0x81d   :  { %1195 = vadd.xlane.f32.xlu0 %v1194_v43 }
 0x8a6   :  { %v1193_v58 = vpop.xlane.xlu0 %1192 }
 0x8a7   :  { %v1197_v59 = vmul.f32 0.03125, %v1193_v58 }
 0x8a9   :  { %v1199_v60 = vadd.f32 1e-05, %v1197_v59 }
 0x8aa   :  { %v1196_v50 = vpop.xlane.xlu0 %1195 }
 0x8ab   :  { %1744 = vrsqrt.f32 %v1199_v60  ;;  %v1198_v62 = vmul.f32 0.03125, %v1196_v50 }
 0x8ad   :  { %v1200_v57 = vadd.f32 1e-05, %v1198_v62 }
 0x8af   :  { %1746 = vrsqrt.f32 %v1200_v57 }
 0x8b5   :  { %v1745_v61 = vpop.eup %1744 }
 0x8b6   :  { %v1203_v63 = vmul.f32 %v1745_v61, %v1187_v36 }
 0x8b8   :  { %v1211_v2 = vmul.f32 %v1447_v0, %v1203_v63 }
 0x8b9   :  { %v1747_v1 = vpop.eup %1746 }
 0x8ba   :  { %v1204_v3 = vmul.f32 %v1747_v1, %v1188_v38  ;;  %v1219_v6 = vadd.f32 %v1448_v4, %v1211_v2 }
 0x8bc   :  { %v1212_v5 = vmul.f32 %v1447_v0, %v1204_v3 }
 0x8be   :  { %v1220_v7 = vadd.f32 %v1448_v4, %v1212_v5 }
 0x8c0   :  { %v1221_v8 = vpack.c.bf16 %v1220_v7, %v1219_v6 }
 0x8c2   :  { %1629 = vmatmul.mubr.msk.bf16.vlgmr.msra.gmra.mrb[40].mxu0 %vm47_vm0, %v1221_v8 }
 0x995   :  { %v1282_v12 = vpop.f32.mrb[40].mxu0 }
 0x996   :  { %v1283_v13 = vadd.f32 %v1449_v11, %v1282_v12  ;;  %v1630_v16 = vpop.f32.mrb[41].mxu0 }
 0x997   :  { %v1285_v14 = vpop.f32.mrb[42].mxu0 }
 0x998   :  { %v1286_v17 = vadd.f32 %v1449_v11, %v1285_v14  ;;  %v1631_v56 = vpop.f32.mrb[43].mxu0  ;;  %v1289_v18 = vmax.f32 %v1283_v13, 0.0 }
 0x99a   :  { %v1290_v19 = vmax.f32 %v1286_v17, 0.0 }
 0x99c   :  { %v1291_v21 = vpack.c.bf16 %v1290_v19, %v1289_v18 }
 0x99e   :  { %1649 = vmatmul.mubr.bf16.vlgmr.msra.gmra.mrb[32].mxu1 %v1291_v21 }
 0xa71   :  { %v1397_v22 = vpop.f32.mrb[32].mxu1 }
 0xa72   :  { %v1398_v23 = vadd.f32 %v1453_v15, %v1397_v22  ;;  %v1650_v24 = vpop.f32.mrb[33].mxu1 }
 0xa73   :  { %v1400_v47 = vpop.f32.mrb[34].mxu1 }
 0xa74   :  { %1404 = vst.msk [vmem:[#allocation2] sm:$0xff] %vm47_vm0, %v1398_v23  ;;  %v1401_v39 = vadd.f32 %v1453_v15, %v1400_v47  ;;  %v1651_v48 = vpop.f32.mrb[35].mxu1 }
 0xa76   :  { %1405 = vst.msk [vmem:[#allocation2 + $0x8] sm:$0xff] %vm47_vm0, %v1401_v39 }
 0xa77   :  { %1759 = shalt.err (!%p1756_p4)
}
 0xa78   :  { %s1760_s26 = scalar_lea.hbm %s2180_s12, 256 }
 0xa79   :  { %p1761_p5 = scmp.ne.s32.totalorder %s2180_s12, %s1760_s26  ;;  %p1764_p6 = scmp.lt.u32.totalorder %s1760_s26, %s2180_s12 }
 0xa7b   :  { %p1766_p7 = pnand %p1764_p6, %p1761_p5 }
 0xa7d   :  { %1769 = shalt.err (!%p1766_p7)
}
 0xa7e   :  { %s1783_s30 = smov 128  }
 0xa7f   :  { %1417 = dma.vmem_to_hbm [thread:$0]  %s1412_s0, 256, %s2180_s12, [#allocation3], %s1783_s30, %s1783_s30, %s1779_s16  }
 0xa80   :  { %1770 = dma.done.wait [#allocation3], 256  }
 0xa81   :  { %1771 = vsyncadd [#allocation3], 4294967040 }
 0xa82   :  { %1421 = vsyncpa [#allocation3], 1 }

</bundles_post_ra>
